<compile_context>
chip_gen: v7x
topology: tpu7x:2x2x1
jax: 0.10.0
libtpu: 0.0.40
codegen_flags: <defaults>
</compile_context>

<pallas_src>
import jax
import jax.numpy as jnp
from jax import lax
from jax.experimental import pallas as pl
from jax.experimental.pallas import tpu as pltpu
import numpy as np


# ----------------------------------------------------------------------------
# Kernel 1: Linear1 + SiLU + hoisted input-to-hidden gate matmul (per direction)
# ----------------------------------------------------------------------------
def prep_kernel(x_ref, w1_ref, b1_ref, wih_ref, bias_ref, gx_ref):
    # x_ref:    (T*B, F)      time-major flattened input
    # w1_ref:   (F, H)        first linear (transposed vs torch)
    # b1_ref:   (1, H)
    # wih_ref:  (ndir, H, 4H) input-to-hidden per direction (gate order i,f,g,o)
    # bias_ref: (ndir, 1, 4H) bih + bhh pre-added per direction
    # gx_ref:   (ndir, T*B, 4H) hoisted input gates
    z = jnp.dot(x_ref[...], w1_ref[...],
                preferred_element_type=jnp.float32) + b1_ref[...]
    a = z * jax.nn.sigmoid(z)                                  # SiLU, EUP logistic
    ndir = gx_ref.shape[0]
    for dd in range(ndir):                                     # static unroll
        gx_ref[dd] = (jnp.dot(a, wih_ref[dd],
                              preferred_element_type=jnp.float32)
                      + bias_ref[dd]).astype(gx_ref.dtype)


def pallas_prep(x2, w1, b1, wih_s, bias_s):
    M = x2.shape[0]
    ndir, _, H4 = wih_s.shape
    return pl.pallas_call(
        prep_kernel,
        out_shape=jax.ShapeDtypeStruct((ndir, M, H4), jnp.float32),
        in_specs=[pl.BlockSpec(memory_space=pltpu.MemorySpace.VMEM)] * 5,
        out_specs=pl.BlockSpec(memory_space=pltpu.MemorySpace.VMEM),
    )(x2, w1, b1, wih_s, bias_s)


# ----------------------------------------------------------------------------
# Kernel 2: LSTM recurrence only.  grid=(ndir,), direction index drives the
# in-kernel sequence reversal for the backward direction.
# ----------------------------------------------------------------------------
def lstm_kernel(gx_ref, whh_ref, hseq_ref, h_sc, c_sc):
    # gx_ref:   (T, B, 4H)  hoisted input gates (+ both biases) for this direction
    # whh_ref:  (H, 4H)     hidden-to-hidden for this direction
    # hseq_ref: (T, B, H)   output hidden sequence (time-major)
    # h_sc/c_sc:(B, H)      recurrent state scratch (VMEM)
    T, B, H = hseq_ref.shape
    d = pl.program_id(0)                       # 0 = forward, 1 = backward

    whh = whh_ref[...]                         # loaded once, loop-invariant
    h_sc[...] = jnp.zeros_like(h_sc)
    c_sc[...] = jnp.zeros_like(c_sc)

    # Static lane mask: only the 'g' (cell candidate) block uses tanh; the rest
    # use sigmoid.  Activations are applied on the full (B, 4H) vreg.
    lane = lax.broadcasted_iota(jnp.int32, (B, 4 * H), 1)
    is_g = (lane >= 2 * H) & (lane < 3 * H)

    def step(t, carry):
        tt = jnp.where(d == 1, T - 1 - t, t)   # in-kernel reversal for bwd dir
        g = gx_ref[tt] + jnp.dot(h_sc[...], whh,
                                 preferred_element_type=jnp.float32)   # (B, 4H)
        act = jnp.where(is_g, jnp.tanh(g), jax.nn.sigmoid(g))          # EUP
        i_g = act[:, 0 * H:1 * H]
        f_g = act[:, 1 * H:2 * H]
        g_g = act[:, 2 * H:3 * H]
        o_g = act[:, 3 * H:4 * H]
        c_new = f_g * c_sc[...] + i_g * g_g
        h_new = o_g * jnp.tanh(c_new)
        c_sc[...] = c_new
        h_sc[...] = h_new
        hseq_ref[tt] = h_new.astype(hseq_ref.dtype)
        return carry

    # T is static; full unroll gives the scheduler cross-step visibility.
    lax.fori_loop(0, T, step, 0, unroll=True)


def pallas_lstm_recurrence(gx, whh_s):
    ndir, T, B, H4 = gx.shape
    H = whh_s.shape[1]
    return pl.pallas_call(
        lstm_kernel,
        out_shape=jax.ShapeDtypeStruct((ndir, T, B, H), jnp.float32),
        grid=(ndir,),
        in_specs=[
            pl.BlockSpec((None, T, B, H4), lambda dd: (dd, 0, 0, 0)),
            pl.BlockSpec((None, H, H4), lambda dd: (dd, 0, 0)),
        ],
        out_specs=pl.BlockSpec((None, T, B, H), lambda dd: (dd, 0, 0, 0)),
        scratch_shapes=[pltpu.VMEM((B, H), jnp.float32),
                        pltpu.VMEM((B, H), jnp.float32)],
        compiler_params=pltpu.CompilerParams(
            dimension_semantics=("parallel",)),   # fwd/bwd on separate TCs (v7x)
    )(gx, whh_s)


# ----------------------------------------------------------------------------
# Kernel 3: output projection without materializing the fwd/bwd concat.
# ----------------------------------------------------------------------------
def proj_kernel(h_ref, w2_ref, b2_ref, o_ref):
    # h_ref: (ndir, T*B, H); w2_ref: (ndir*H, C); b2_ref: (1, C); o_ref: (T*B, C)
    ndir, _, H = h_ref.shape
    acc = jnp.dot(h_ref[0], w2_ref[0:H, :], preferred_element_type=jnp.float32)
    if ndir == 2:
        acc = acc + jnp.dot(h_ref[1], w2_ref[H:2 * H, :],
                            preferred_element_type=jnp.float32)
    o_ref[...] = (acc + b2_ref[...]).astype(o_ref.dtype)


def pallas_proj(h2, w2, b2):
    _, M, _ = h2.shape
    C = w2.shape[1]
    return pl.pallas_call(
        proj_kernel,
        out_shape=jax.ShapeDtypeStruct((M, C), jnp.float32),
        in_specs=[pl.BlockSpec(memory_space=pltpu.MemorySpace.VMEM)] * 3,
        out_specs=pl.BlockSpec(memory_space=pltpu.MemorySpace.VMEM),
    )(h2, w2, b2)


# ----------------------------------------------------------------------------
# Plain linear kernel (head_type='linear')
# ----------------------------------------------------------------------------
def linear_kernel(x_ref, w_ref, b_ref, o_ref):
    o_ref[...] = (jnp.dot(x_ref[...], w_ref[...],
                          preferred_element_type=jnp.float32)
                  + b_ref[...]).astype(o_ref.dtype)


def pallas_linear(x2, w, b):
    M = x2.shape[0]
    N = w.shape[1]
    return pl.pallas_call(
        linear_kernel,
        out_shape=jax.ShapeDtypeStruct((M, N), jnp.float32),
        in_specs=[pl.BlockSpec(memory_space=pltpu.MemorySpace.VMEM)] * 3,
        out_specs=pl.BlockSpec(memory_space=pltpu.MemorySpace.VMEM),
    )(x2, w, b)


# ----------------------------------------------------------------------------
# Head wrapper (mirrors the PyTorch module's forward)
# ----------------------------------------------------------------------------
def head_forward(x, params, head_type="lstm", bidirectional=True):
    if head_type == "linear":
        B, T, F = x.shape
        y = pallas_linear(x.reshape(B * T, F), params["w_lin"], params["b_lin"])
        return y.reshape(B, T, -1)

    if head_type != "lstm":
        raise ValueError("Unknown head type")

    B, T, F = x.shape
    H = params["w1"].shape[1]

    # batch_first -> time-major; (T,B,F)->(T*B,F) reshape is free (contiguous)
    x2 = jnp.transpose(x, (1, 0, 2)).reshape(T * B, F)

    # Stack per-direction weights; pre-add the two LSTM biases once.
    if bidirectional:
        wih_s = jnp.stack([params["wih_f"], params["wih_b"]])
        whh_s = jnp.stack([params["whh_f"], params["whh_b"]])
        bias_s = jnp.stack([params["bih_f"] + params["bhh_f"],
                            params["bih_b"] + params["bhh_b"]])
    else:
        wih_s = params["wih_f"][None]
        whh_s = params["whh_f"][None]
        bias_s = (params["bih_f"] + params["bhh_f"])[None]

    gx = pallas_prep(x2, params["w1"], params["b1"], wih_s, bias_s)   # (ndir,T*B,4H)
    gx = gx.reshape(gx.shape[0], T, B, 4 * H)                         # free dim split
    hseq = pallas_lstm_recurrence(gx, whh_s)                          # (ndir,T,B,H)

    h2 = hseq.reshape(hseq.shape[0], T * B, H)                        # free dim merge
    y = pallas_proj(h2, params["w2"], params["b2"])                   # (T*B, C)
    y = y.reshape(T, B, -1)
    return jnp.transpose(y, (1, 0, 2))                                # (B, T, C)


# ----------------------------------------------------------------------------
# Pure-JAX reference (same math, lax.scan recurrence) for validation
# ----------------------------------------------------------------------------
def head_reference(x, params, head_type="lstm", bidirectional=True):
    def _sigmoid(z):
        return 1.0 / (1.0 + jnp.exp(-z))

    if head_type == "linear":
        return x @ params["w_lin"] + params["b_lin"]

    z = x @ params["w1"] + params["b1"]
    a = z * _sigmoid(z)
    a_tm = jnp.transpose(a, (1, 0, 2))                        # (T, B, H)
    B = a_tm.shape[1]
    H = params["whh_f"].shape[0]

    def run_dir(seq, wih, whh, bih, bhh):
        def step(carry, xt):
            h, c = carry
            g = xt @ wih + h @ whh + bih + bhh
            i_g = _sigmoid(g[:, :H]); f_g = _sigmoid(g[:, H:2 * H])
            g_g = jnp.tanh(g[:, 2 * H:3 * H]); o_g = _sigmoid(g[:, 3 * H:])
            c = f_g * c + i_g * g_g
            h = o_g * jnp.tanh(c)
            return (h, c), h
        init = (jnp.zeros((B, H), jnp.float32), jnp.zeros((B, H), jnp.float32))
        _, hs = lax.scan(step, init, seq)
        return hs

    h_f = run_dir(a_tm, params["wih_f"], params["whh_f"],
                  params["bih_f"], params["bhh_f"])
    outs = [h_f]
    if bidirectional:
        h_b = run_dir(a_tm[::-1], params["wih_b"], params["whh_b"],
                      params["bih_b"], params["bhh_b"])[::-1]
        outs.append(h_b)
    h = jnp.concatenate(outs, axis=-1)
    y = h @ params["w2"] + params["b2"]
    return jnp.transpose(y, (1, 0, 2))


# ----------------------------------------------------------------------------
# Deterministic parameter construction
# ----------------------------------------------------------------------------
def make_params(key, in_f, hidden, num_classes, bidirectional):
    keys = jax.random.split(key, 16)
    s = 0.1
    D = hidden * (1 + int(bidirectional))
    p = {
        # lstm head
        "w1":    s * jax.random.normal(keys[0], (in_f, hidden), jnp.float32),
        "b1":    s * jax.random.normal(keys[1], (1, hidden), jnp.float32),
        "wih_f": s * jax.random.normal(keys[2], (hidden, 4 * hidden), jnp.float32),
        "bih_f": s * jax.random.normal(keys[3], (1, 4 * hidden), jnp.float32),
        "whh_f": s * jax.random.normal(keys[4], (hidden, 4 * hidden), jnp.float32),
        "bhh_f": s * jax.random.normal(keys[5], (1, 4 * hidden), jnp.float32),
        "wih_b": s * jax.random.normal(keys[6], (hidden, 4 * hidden), jnp.float32),
        "bih_b": s * jax.random.normal(keys[7], (1, 4 * hidden), jnp.float32),
        "whh_b": s * jax.random.normal(keys[8], (hidden, 4 * hidden), jnp.float32),
        "bhh_b": s * jax.random.normal(keys[9], (1, 4 * hidden), jnp.float32),
        "w2":    s * jax.random.normal(keys[10], (D, num_classes), jnp.float32),
        "b2":    s * jax.random.normal(keys[11], (1, num_classes), jnp.float32),
        # linear head
        "w_lin": s * jax.random.normal(keys[12], (in_f, num_classes), jnp.float32),
        "b_lin": s * jax.random.normal(keys[13], (1, num_classes), jnp.float32),
    }
    return p


if __name__ == "__main__":
    B, T, in_f = 2, 8, 16
    hidden, num_classes = 32, 4
    bidirectional = True

    key = jax.random.PRNGKey(0)
    kx, kp = jax.random.split(key)
    x = jax.random.normal(kx, (B, T, in_f), jnp.float32)
    params = make_params(kp, in_f, hidden, num_classes, bidirectional)

    # LSTM head
    y_lstm = head_forward(x, params, head_type="lstm", bidirectional=bidirectional)
    y_lstm = jax.block_until_ready(y_lstm)
    y_lstm_ref = head_reference(x, params, head_type="lstm",
                                bidirectional=bidirectional)
    np.testing.assert_allclose(np.asarray(y_lstm), np.asarray(y_lstm_ref),
                               rtol=2e-3, atol=2e-3)
    assert y_lstm.shape == (B, T, num_classes)

    # Linear head
    y_lin = head_forward(x, params, head_type="linear")
    y_lin = jax.block_until_ready(y_lin)
    y_lin_ref = head_reference(x, params, head_type="linear")
    np.testing.assert_allclose(np.asarray(y_lin), np.asarray(y_lin_ref),
                               rtol=2e-3, atol=2e-3)
    assert y_lin.shape == (B, T, num_classes)

    print("KERNEL_OK")
</pallas_src>

<mosaic_0001>
module attributes {stable_mosaic.version = 11 : i64} {
  func.func @prep_kernel(%arg0: memref<16x16xf32, #tpu.memory_space<vmem>>, %arg1: memref<16x32xf32, #tpu.memory_space<vmem>>, %arg2: memref<1x32xf32, #tpu.memory_space<vmem>>, %arg3: memref<2x32x128xf32, #tpu.memory_space<vmem>>, %arg4: memref<2x1x128xf32, #tpu.memory_space<vmem>>, %arg5: memref<2x16x128xf32, #tpu.memory_space<vmem>>) attributes {dimension_semantics = [], scalar_prefetch = 0 : i64, scratch_operands = 0 : i64, tpu.core_type = #tpu.core_type<tc>} {
    %c0 = arith.constant 0 : index
    %c0_0 = arith.constant 0 : index
    %0 = vector.load %arg0[%c0, %c0_0] : memref<16x16xf32, #tpu.memory_space<vmem>>, vector<16x16xf32>
    %c0_1 = arith.constant 0 : index
    %c0_2 = arith.constant 0 : index
    %1 = vector.load %arg1[%c0_1, %c0_2] : memref<16x32xf32, #tpu.memory_space<vmem>>, vector<16x32xf32>
    %cst = arith.constant dense<0.000000e+00> : vector<16x32xf32>
    %2 = tpu.matmul %0, %1, %cst {dimension_numbers = #tpu.dot_dimension_numbers<[1], [0], [0], [1], [0, 0, 1, 1], [], []>} : vector<16x16xf32>, vector<16x32xf32>, vector<16x32xf32> -> vector<16x32xf32>
    %c0_3 = arith.constant 0 : index
    %c0_4 = arith.constant 0 : index
    %3 = vector.load %arg2[%c0_3, %c0_4] : memref<1x32xf32, #tpu.memory_space<vmem>>, vector<1x32xf32>
    %4 = vector.broadcast %3 : vector<1x32xf32> to vector<16x32xf32>
    %5 = arith.addf %2, %4 : vector<16x32xf32>
    %6 = arith.negf %5 : vector<16x32xf32>
    %7 = math.exp %6 : vector<16x32xf32>
    %cst_5 = arith.constant 1.000000e+00 : f32
    %8 = vector.broadcast %cst_5 : f32 to vector<16x32xf32>
    %9 = arith.addf %8, %7 : vector<16x32xf32>
    %10 = arith.divf %8, %9 : vector<16x32xf32>
    %11 = arith.mulf %5, %10 : vector<16x32xf32>
    %c0_6 = arith.constant 0 : index
    %c0_7 = arith.constant 0 : index
    %c0_8 = arith.constant 0 : index
    %12 = vector.load %arg3[%c0_6, %c0_7, %c0_8] : memref<2x32x128xf32, #tpu.memory_space<vmem>>, vector<1x32x128xf32>
    %13 = vector.shape_cast %12 : vector<1x32x128xf32> to vector<32x128xf32>
    %cst_9 = arith.constant dense<0.000000e+00> : vector<16x128xf32>
    %14 = tpu.matmul %11, %13, %cst_9 {dimension_numbers = #tpu.dot_dimension_numbers<[1], [0], [0], [1], [0, 0, 1, 1], [], []>} : vector<16x32xf32>, vector<32x128xf32>, vector<16x128xf32> -> vector<16x128xf32>
    %c0_10 = arith.constant 0 : index
    %c0_11 = arith.constant 0 : index
    %c0_12 = arith.constant 0 : index
    %15 = vector.load %arg4[%c0_10, %c0_11, %c0_12] : memref<2x1x128xf32, #tpu.memory_space<vmem>>, vector<1x1x128xf32>
    %16 = vector.shape_cast %15 : vector<1x1x128xf32> to vector<1x128xf32>
    %17 = vector.broadcast %16 : vector<1x128xf32> to vector<16x128xf32>
    %18 = arith.addf %14, %17 : vector<16x128xf32>
    %c0_13 = arith.constant 0 : index
    %c0_14 = arith.constant 0 : index
    %c0_15 = arith.constant 0 : index
    %19 = vector.load %arg5[%c0_13, %c0_14, %c0_15] : memref<2x16x128xf32, #tpu.memory_space<vmem>>, vector<1x16x128xf32>
    %20 = vector.shape_cast %19 : vector<1x16x128xf32> to vector<16x128xf32>
    %21 = vector.shape_cast %18 : vector<16x128xf32> to vector<1x16x128xf32>
    tpu.vector_store %arg5[%c0_13, %c0_14, %c0_15], %21 {strides = array<i32>} : memref<2x16x128xf32, #tpu.memory_space<vmem>>, vector<1x16x128xf32>,
    %c1 = arith.constant 1 : index
    %c0_16 = arith.constant 0 : index
    %c0_17 = arith.constant 0 : index
    %22 = vector.load %arg3[%c1, %c0_16, %c0_17] : memref<2x32x128xf32, #tpu.memory_space<vmem>>, vector<1x32x128xf32>
    %23 = vector.shape_cast %22 : vector<1x32x128xf32> to vector<32x128xf32>
    %cst_18 = arith.constant dense<0.000000e+00> : vector<16x128xf32>
    %24 = tpu.matmul %11, %23, %cst_18 {dimension_numbers = #tpu.dot_dimension_numbers<[1], [0], [0], [1], [0, 0, 1, 1], [], []>} : vector<16x32xf32>, vector<32x128xf32>, vector<16x128xf32> -> vector<16x128xf32>
    %c1_19 = arith.constant 1 : index
    %c0_20 = arith.constant 0 : index
    %c0_21 = arith.constant 0 : index
    %25 = vector.load %arg4[%c1_19, %c0_20, %c0_21] : memref<2x1x128xf32, #tpu.memory_space<vmem>>, vector<1x1x128xf32>
    %26 = vector.shape_cast %25 : vector<1x1x128xf32> to vector<1x128xf32>
    %27 = vector.broadcast %26 : vector<1x128xf32> to vector<16x128xf32>
    %28 = arith.addf %24, %27 : vector<16x128xf32>
    %c1_22 = arith.constant 1 : index
    %c0_23 = arith.constant 0 : index
    %c0_24 = arith.constant 0 : index
    %29 = vector.load %arg5[%c1_22, %c0_23, %c0_24] : memref<2x16x128xf32, #tpu.memory_space<vmem>>, vector<1x16x128xf32>
    %30 = vector.shape_cast %29 : vector<1x16x128xf32> to vector<16x128xf32>
    %31 = vector.shape_cast %28 : vector<16x128xf32> to vector<1x16x128xf32>
    tpu.vector_store %arg5[%c1_22, %c0_23, %c0_24], %31 {strides = array<i32>} : memref<2x16x128xf32, #tpu.memory_space<vmem>>, vector<1x16x128xf32>,
    return
  }
}

</mosaic_0001>

<bundles_post_ra>
// kernel: tpu_custom_call.1
= control target key start
LH: loop header
LB: loop body
LE: loop exit
PB: predicated region body
PF: predicated region fallthrough
CT: control target
= control target key end

     0   :  { %10 = vsyncpa [#allocation3], 0  ;;  %s670_s0 = inlined_call_operand.hbm [shape: f32[16,16], index: 0, kind: input, shape index: {}]   ;;  %s671_s1 = inlined_call_operand.hbm [shape: f32[16,32], index: 1, kind: input, shape index: {}]   ;;  %s672_s2 = inlined_call_operand.vmem [shape: f32[1,32], index: 2, kind: input, shape index: {}]   ;;  %s673_s3 = inlined_call_operand.hbm [shape: f32[2,32,128], index: 3, kind: input, shape index: {}]   ;;  %s674_s4 = inlined_call_operand.vmem [shape: f32[2,1,128], index: 4, kind: input, shape index: {}]   ;;  %s675_s5 = inlined_call_operand.hbm [shape: f32[2,16,128], index: 5, kind: output, shape index: {}]  }
   0x1   :  { %11 = vsyncpa [#allocation6], 0 }
   0x2   :  { %12 = vsyncpa [#allocation4], 0  ;;  %s558_s18 = smov [#allocation5]   ;;  %s559_s20 = smov [#allocation2]  }
   0x3   :  { %s30_s19 = sshll.u32 %s558_s18, 4  ;;  %s18_s21 = sshll.u32 %s559_s20, 4  ;;  %s31_s19 = int_to_ptr.vmem [resolvable:$true] %s30_s19  ;;  %s594_s21 = int_to_ptr.vmem [resolvable:$true] %s18_s21 }
   0x4   :  { %s464_s24 = scalar_lea.hbm %s671_s1, 256 }
   0x5   :  { %p465_p0 = scmp.ne.s32.totalorder %s671_s1, %s464_s24  ;;  %p468_p1 = scmp.lt.u32.totalorder %s464_s24, %s671_s1 }
   0x7   :  { %p470_p2 = pnand %p468_p1, %p465_p0 }
   0x9   :  { %473 = shalt.err (!%p470_p2)
}
   0xa   :  { %s474_s29 = scalar_lea.vmem %s31_s19, 256  ;;  %p479_p4 = scmp.lt.s32.totalorder %s31_s19, %s31_s19 }
   0xb   :  { %p475_p3 = scmp.ne.s32.totalorder %s31_s19, %s474_s29  ;;  %p480_p5 = scmp.lt.s32.totalorder %s474_s29, %s474_s29 }
   0xd   :  { %p481_p6 = por %p480_p5, %p479_p4 }
   0xf   :  { %p482_p7 = pnand %p481_p6, %p475_p3 }
  0x11   :  { %485 = shalt.err (!%p482_p7)
}
  0x12   :  { %s560_s30 = smov 128   ;;  %s561_s6 = smov 8  }
  0x13   :  { %36 = dma.hbm_to_vmem [thread:$0]  %s671_s1, 256, %s31_s19, [#allocation6], %s560_s30, %s560_s30, %s561_s6  }
  0x14   :  { %s486_s11 = scalar_lea.hbm %s670_s0, 256 }
  0x15   :  { %p487_p8 = scmp.ne.s32.totalorder %s670_s0, %s486_s11  ;;  %p490_p9 = scmp.lt.u32.totalorder %s486_s11, %s670_s0 }
  0x17   :  { %p492_p10 = pnand %p490_p9, %p487_p8 }
  0x19   :  { %495 = shalt.err (!%p492_p10)
}
  0x1a   :  { %s496_s16 = scalar_lea.vmem %s594_s21, 256  ;;  %p501_p12 = scmp.lt.s32.totalorder %s594_s21, %s594_s21 }
  0x1b   :  { %p497_p11 = scmp.ne.s32.totalorder %s594_s21, %s496_s16  ;;  %p502_p13 = scmp.lt.s32.totalorder %s496_s16, %s496_s16 }
  0x1d   :  { %p503_p0 = por %p502_p13, %p501_p12 }
  0x1f   :  { %p504_p1 = pnand %p503_p0, %p497_p11 }
  0x21   :  { %507 = shalt.err (!%p504_p1)
}
  0x22   :  { %24 = dma.hbm_to_vmem [thread:$0]  %s670_s0, 256, %s594_s21, [#allocation3], %s560_s30, %s560_s30, %s561_s6  }
  0x23   :  { %s562_s18 = smov [#allocation7]   ;;  %s508_s23 = scalar_lea.hbm %s673_s3, 1024 }
  0x24   :  { %s44_s19 = sshll.u32 %s562_s18, 4  ;;  %p509_p2 = scmp.ne.s32.totalorder %s673_s3, %s508_s23  ;;  %s45_s19 = int_to_ptr.vmem [resolvable:$true] %s44_s19 }
  0x25   :  { %p512_p3 = scmp.lt.u32.totalorder %s508_s23, %s673_s3 }
  0x27   :  { %p514_p4 = pnand %p512_p3, %p509_p2 }
  0x29   :  { %517 = shalt.err (!%p514_p4)
}
  0x2a   :  { %s518_s28 = scalar_lea.vmem %s45_s19, 1024  ;;  %p523_p6 = scmp.lt.s32.totalorder %s45_s19, %s45_s19 }
  0x2b   :  { %p519_p5 = scmp.ne.s32.totalorder %s45_s19, %s518_s28  ;;  %p524_p7 = scmp.lt.s32.totalorder %s518_s28, %s518_s28 }
  0x2d   :  { %p525_p8 = por %p524_p7, %p523_p6 }
  0x2f   :  { %p526_p9 = pnand %p525_p8, %p519_p5 }
  0x31   :  { %529 = shalt.err (!%p526_p9)
}
  0x32   :  { %50 = dma.hbm_to_vmem [thread:$0]  %s673_s3, 1024, %s45_s19, [#allocation6], %s560_s30, %s560_s30, %s561_s6  }
  0x33   :  { %552 = dma.done.wait [#allocation3], 256  }
  0x34   :  { %553 = vsyncadd [#allocation3], 4294967040 }
  0x35   :  { %554 = dma.done.wait [#allocation6], 1280  }
  0x36   :  { %555 = vsyncadd [#allocation6], 4294966016  ;;  %vm73_vm0 = vcmask 130048   ;;  %v64_v0 = vld [vmem:[#allocation5] sm:$0xff]  ;;  %v65_v1 = vld [vmem:[#allocation5 + $0x8] sm:$0xff]  ;;  %vm180_vm1 = vcmask 261120  }
  0x37   :  { %v62_v2 = vld [vmem:[#allocation2] sm:$0xff]  ;;  %v430_v3 = vpack.c.bf16 %v65_v1, %v64_v0  ;;  %v63_v4 = vld [vmem:[#allocation2 + $0x8] sm:$0xff]  ;;  %v171_v11 = vld [vmem:[#allocation7 + $0x10] sm:$0xff]  ;;  %s563_s10 = smov [#allocation8]  }
  0x38   :  { %405 = vmatprep.mubr.msk.f32.mxu0 %vm73_vm0, %v62_v2  ;;  %v169_v5 = vld [vmem:[#allocation7] sm:$0xff]  ;;  %v170_v6 = vld [vmem:[#allocation7 + $0x8] sm:$0xff]  ;;  %v172_v12 = vld [vmem:[#allocation7 + $0x18] sm:$0xff]  ;;  %s360_s11 = sshll.u32 %s563_s10, 4  ;;  %s361_s11 = int_to_ptr.vmem [resolvable:$true] %s360_s11 }
  0x39   :  { %431 = vmatprep.subr.bf16.mxu0 %v430_v3  ;;  %v265_v7 = vld [vmem:[#allocation7 + $0x20] sm:$0xff]  ;;  %v434_v8 = vpack.c.bf16 %v170_v6, %v169_v5  ;;  %v266_v9 = vld [vmem:[#allocation7 + $0x28] sm:$0xff]  ;;  %v267_v13 = vld [vmem:[#allocation7 + $0x30] sm:$0xff]  ;;  %v438_v14 = vpack.c.bf16 %v172_v12, %v171_v11  ;;  %s530_s12 = scalar_lea.vmem %s361_s11, 512  ;;  %p535_p11 = scmp.lt.s32.totalorder %s361_s11, %s361_s11 }
  0x3a   :  { %433 = vmatpush3.bf16.msra.mxu0 %v430_v3  ;;  %v442_v10 = vpack.c.bf16 %v266_v9, %v265_v7  ;;  %v268_v15 = vld [vmem:[#allocation7 + $0x38] sm:$0xff]  ;;  %v373_v17 = vld [vmem:[%s672_s2] ss:$0 sm:$0xff]  ;;  %v382_v33 = vld [vmem:[%s674_s4 + $0x1] ss:$0 sm:$0xff]  ;;  %p531_p10 = scmp.ne.s32.totalorder %s361_s11, %s530_s12  ;;  %p536_p12 = scmp.lt.s32.totalorder %s530_s12, %s530_s12 }
  0x3b   :  { %435 = vmatprep.subr.bf16.mxu1 %v434_v8  ;;  %v446_v16 = vpack.c.bf16 %v268_v15, %v267_v13  ;;  %v378_v32 = vld [vmem:[%s674_s4] ss:$0 sm:$0xff] }
  0x3c   :  { %443 = vmatprep.subr.bf16.mxu0 %v442_v10  ;;  %437 = vmatpush3.bf16.msra.mxu1 %v434_v8  ;;  %p537_p13 = por %p536_p12, %p535_p11 }
  0x3d   :  { %406 = vmatmul.mubr.msk.f32.vlgmr.msra.gmra.mrb[0].mxu0 %vm73_vm0, %v63_v4  ;;  %439 = vmatprep.subr.bf16.mxu1 %v438_v14 }
  0x3e   :  { %445 = vmatpush3.bf16.msra.mxu0 %v442_v10  ;;  %p538_p0 = pnand %p537_p13, %p531_p10 }
  0x3f   :  { %447 = vmatprep.subr.bf16.mxu0 %v446_v16 }
  0x40   :  { %441 = vmatpush3.bf16.msra.mxu1 %v438_v14 }
  0x42   :  { %449 = vmatpush3.bf16.msra.mxu0 %v446_v16 }
 0x110   :  { %v407_v18 = vpop.f32.mrb[0].mxu0 }
 0x111   :  { %v152_v19 = vadd.f32 %v407_v18, %v373_v17  ;;  %v146_v20 = vpop.f32.mrb[1].mxu0 }
 0x112   :  { %v147_v21 = vadd.f32 %v373_v17, %v146_v20 }
 0x113   :  { %v377_v22 = vmul.f32 -1.442695, %v152_v19 }
 0x114   :  { %v376_v23 = vmul.f32 -1.442695, %v147_v21 }
 0x115   :  { %456 = vpow2.f32 %v377_v22 }
 0x116   :  { %458 = vpow2.f32 %v376_v23 }
 0x11f   :  { %v457_v24 = vpop.eup %456 }
 0x120   :  { %v459_v25 = vpop.eup %458  ;;  %v162_v26 = vadd.f32 1.0, %v457_v24 }
 0x121   :  { %v161_v27 = vadd.f32 1.0, %v459_v25 }
 0x122   :  { %460 = vrcp.f32 %v162_v26 }
 0x123   :  { %462 = vrcp.f32 %v161_v27 }
 0x12c   :  { %v461_v28 = vpop.eup %460 }
 0x12d   :  { %v463_v29 = vpop.eup %462  ;;  %v168_v31 = vmul.f32 %v461_v28, %v152_v19 }
 0x12e   :  { %v167_v30 = vmul.f32 %v463_v29, %v147_v21 }
 0x130   :  { %416 = vmatprep.mubr.msk.f32.mxu1 %vm180_vm1, %v167_v30  ;;  %427 = vmatprep.mubr.msk.f32.mxu0 %vm180_vm1, %v167_v30 }
 0x131   :  { %417 = vmatmul.mubr.msk.f32.vlgmr.msra.gmra.mrb[0].mxu1 %vm180_vm1, %v168_v31  ;;  %428 = vmatmul.mubr.msk.f32.vlgmr.msra.gmra.mrb[2].mxu0 %vm180_vm1, %v168_v31 }
 0x204   :  { %v418_v34 = vpop.f32.mrb[0].mxu1  ;;  %v429_v35 = vpop.f32.mrb[2].mxu0 }
 0x205   :  { %v259_v36 = vadd.f32 %v418_v34, %v378_v32  ;;  %v349_v37 = vadd.f32 %v429_v35, %v382_v33  ;;  %v253_v38 = vpop.f32.mrb[1].mxu1  ;;  %v343_v39 = vpop.f32.mrb[3].mxu0 }
 0x206   :  { %v254_v40 = vadd.f32 %v378_v32, %v253_v38  ;;  %v344_v41 = vadd.f32 %v382_v33, %v343_v39 }
 0x207   :  { %263 = vst [vmem:[#allocation8 + $0x8] sm:$0xff] %v259_v36  ;;  %354 = vst [vmem:[#allocation8 + $0x18] sm:$0xff] %v349_v37 }
 0x208   :  { %262 = vst [vmem:[#allocation8] sm:$0xff] %v254_v40  ;;  %353 = vst [vmem:[#allocation8 + $0x10] sm:$0xff] %v344_v41 }
 0x209   :  { %541 = shalt.err (!%p538_p0)
}
 0x20a   :  { %s542_s14 = scalar_lea.hbm %s675_s5, 512 }
 0x20b   :  { %p543_p1 = scmp.ne.s32.totalorder %s675_s5, %s542_s14  ;;  %p546_p2 = scmp.lt.u32.totalorder %s542_s14, %s675_s5 }
 0x20d   :  { %p548_p3 = pnand %p546_p2, %p543_p1 }
 0x20f   :  { %551 = shalt.err (!%p548_p3)
}
 0x210   :  { %366 = dma.vmem_to_hbm [thread:$0]  %s361_s11, 512, %s675_s5, [#allocation4], %s560_s30, %s560_s30, %s561_s6  }
 0x211   :  { %556 = dma.done.wait [#allocation4], 512  }
 0x212   :  { %557 = vsyncadd [#allocation4], 4294966784 }
 0x213   :  { %370 = vsyncpa [#allocation3], 1 }
 0x214   :  { %371 = vsyncpa [#allocation6], 1 }
 0x215   :  { %372 = vsyncpa [#allocation4], 1 }

</bundles_post_ra>
